<compile_context>
chip_gen: v6e
topology: v6e:2x2x1
jax: 0.10.0
libtpu: 0.0.40
codegen_flags: <defaults>
</compile_context>

<pallas_src>
import jax
import jax.numpy as jnp
from jax import lax
from jax.experimental import pallas as pl
from jax.experimental.pallas import tpu as pltpu


IN_FEATURES = 93
IN_PAD = 128          # feature dim zero-padded to a full 128-lane row
HIDDEN = 128
OUT_FEATURES = 1
TB_DEFAULT = 1024     # batch tile (rows); multiple of 128, VMEM-safe on v7x


def _round_up(n, m):
    return ((n + m - 1) // m) * m


def _mlp_kernel(x_ref, w1_ref, b1_ref, w2t_ref, b2_ref, o_ref):
    # x_ref:   (TB, 128)   VMEM   zero-padded input features
    # w1_ref:  (128, 128)  VMEM   zero-padded Linear(93,128) weight, (in, out)
    # b1_ref:  (1, 128)    VMEM
    # w2t_ref: (1, 128)    VMEM   Linear(128,1) weight, transposed (out, in)
    # b2_ref:  (1, 1)      SMEM   scalar bias
    # o_ref:   (1, 1, TB)  VMEM   lane-dense output row for this batch tile
    x = x_ref[...]
    h = jnp.dot(x, w1_ref[...], preferred_element_type=jnp.float32) + b1_ref[...]
    # Dropout(0.5) in eval mode == identity.
    h = jnp.maximum(h, 0.0)  # ReLU
    # (1, 128) x (TB, 128) contracting on the hidden dim -> (1, TB):
    # lane-dense result with no (TB, 1) masked stores and no transpose of h.
    out_row = lax.dot_general(
        w2t_ref[...], h,
        dimension_numbers=(((1,), (1,)), ((), ())),
        preferred_element_type=jnp.float32,
    ) + b2_ref[0, 0]
    o_ref[0] = out_row.astype(o_ref.dtype)


def neural_net_forward(x, w1, b1, w2, b2, *, tb=TB_DEFAULT):
    """x: (B, 93) float32 -> (B, 1) float32 (eval-mode forward)."""
    B = x.shape[0]

    # Batch tile: multiple of 128 (lane-dense output row), no larger than the
    # (padded) batch, capped at `tb` so double-buffered x tiles stay well
    # inside VMEM on every generation (v7x: 64 MiB total).
    tb_eff = min(_round_up(tb, 128), _round_up(B, 128))
    b_pad = _round_up(B, tb_eff)
    num_tiles = b_pad // tb_eff

    # Pad once per call (batch -> tile multiple, features 93 -> 128). Keeping
    # the padded layout upstream would avoid paying this per call.
    x_pad = jnp.pad(x, ((0, b_pad - B), (0, IN_PAD - IN_FEATURES)))
    w1_pad = jnp.pad(w1, ((0, IN_PAD - IN_FEATURES), (0, 0)))
    b1_2d = b1.reshape(1, HIDDEN)
    w2t = w2.reshape(HIDDEN, OUT_FEATURES).T        # (1, 128)
    b2_2d = b2.reshape(1, 1)

    flops = 2 * b_pad * (IN_PAD * HIDDEN + HIDDEN * OUT_FEATURES)
    bytes_accessed = 4 * (b_pad * IN_PAD + IN_PAD * HIDDEN + 2 * HIDDEN + 1 + b_pad)

    out_rows = pl.pallas_call(
        _mlp_kernel,
        out_shape=jax.ShapeDtypeStruct((num_tiles, 1, tb_eff), jnp.float32),
        grid_spec=pltpu.PrefetchScalarGridSpec(
            num_scalar_prefetch=0,
            grid=(num_tiles,),
            in_specs=[
                pl.BlockSpec((tb_eff, IN_PAD), lambda i: (i, 0)),      # x tile
                pl.BlockSpec((IN_PAD, HIDDEN), lambda i: (0, 0)),      # w1 (resident)
                pl.BlockSpec((1, HIDDEN), lambda i: (0, 0)),           # b1 (resident)
                pl.BlockSpec((1, HIDDEN), lambda i: (0, 0)),           # w2^T (resident)
                pl.BlockSpec(memory_space=pltpu.MemorySpace.SMEM),     # b2 scalar
            ],
            out_specs=pl.BlockSpec((1, 1, tb_eff), lambda i: (i, 0, 0)),
        ),
        compiler_params=pltpu.CompilerParams(
            dimension_semantics=("parallel",),
        ),
        cost_estimate=pl.CostEstimate(
            flops=flops, transcendentals=0, bytes_accessed=bytes_accessed),
    )(x_pad, w1_pad, b1_2d, w2t, b2_2d)

    # (num_tiles, 1, TB) lane-dense rows -> (B, 1), dropping batch padding.
    return out_rows.reshape(b_pad, 1)[:B]


def init_params(key):
    """Deterministic init mimicking PyTorch Linear default (uniform +/- 1/sqrt(fan_in))."""
    k1, k2, k3, k4 = jax.random.split(key, 4)
    bound1 = 1.0 / jnp.sqrt(IN_FEATURES)
    bound2 = 1.0 / jnp.sqrt(HIDDEN)
    w1 = jax.random.uniform(k1, (IN_FEATURES, HIDDEN), jnp.float32, -bound1, bound1)
    b1 = jax.random.uniform(k2, (HIDDEN,), jnp.float32, -bound1, bound1)
    w2 = jax.random.uniform(k3, (HIDDEN, OUT_FEATURES), jnp.float32, -bound2, bound2)
    b2 = jax.random.uniform(k4, (OUT_FEATURES,), jnp.float32, -bound2, bound2)
    return w1, b1, w2, b2


if __name__ == "__main__":
    key = jax.random.PRNGKey(0)
    k_x, k_x2, k_p = jax.random.split(key, 3)
    w1, b1, w2, b2 = init_params(k_p)

    def ref_fwd(x):
        # Pure-JAX reference (eval-mode forward: dropout == identity).
        return jnp.maximum(x @ w1 + b1, 0.0) @ w2 + b2

    # Small batch (single tile).
    B = 8
    x = jax.random.normal(k_x, (B, IN_FEATURES), jnp.float32)
    out = jax.block_until_ready(neural_net_forward(x, w1, b1, w2, b2))
    assert out.shape == (B, OUT_FEATURES)
    assert jnp.allclose(out, ref_fwd(x), atol=1e-5, rtol=1e-5), "mismatch (B=8)"

    # Ragged multi-tile batch: exercises the parallel grid + tail padding.
    B2 = 300
    x2 = jax.random.normal(k_x2, (B2, IN_FEATURES), jnp.float32)
    out2 = jax.block_until_ready(neural_net_forward(x2, w1, b1, w2, b2, tb=128))
    assert out2.shape == (B2, OUT_FEATURES)
    assert jnp.allclose(out2, ref_fwd(x2), atol=1e-5, rtol=1e-5), "mismatch (B=300)"

    print("KERNEL_OK")
</pallas_src>

<mosaic_0001>
module attributes {stable_mosaic.version = 11 : i64} {
  func.func @_mlp_kernel(%arg0: i32, %arg1: memref<128x128xf32, #tpu.memory_space<vmem>>, %arg2: memref<128x128xf32, #tpu.memory_space<vmem>>, %arg3: memref<1x128xf32, #tpu.memory_space<vmem>>, %arg4: memref<1x128xf32, #tpu.memory_space<vmem>>, %arg5: memref<1x1xf32, #tpu.memory_space<smem>>, %arg6: memref<1x1x128xf32, #tpu.memory_space<vmem>>) attributes {dimension_semantics = [#tpu.dimension_semantics<parallel>], iteration_bounds = array<i64: 1>, scalar_prefetch = 0 : i64, scratch_operands = 0 : i64, tpu.core_type = #tpu.core_type<tc>, window_params = [{transform_indices = @transform_0, window_bounds = array<i64: 128, 128>}, {pipeline_mode = #tpu.pipeline_mode<synchronous>, transform_indices = @transform_1, window_bounds = array<i64: 128, 128>}, {pipeline_mode = #tpu.pipeline_mode<synchronous>, transform_indices = @transform_2, window_bounds = array<i64: 1, 128>}, {pipeline_mode = #tpu.pipeline_mode<synchronous>, transform_indices = @transform_3, window_bounds = array<i64: 1, 128>}, {transform_indices = @transform_4, window_bounds = array<i64: 1, 1>}, {transform_indices = @transform_5, window_bounds = array<i64: 1, 1, 128>}]} {
    %c0 = arith.constant 0 : index
    %c0_0 = arith.constant 0 : index
    %0 = vector.load %arg1[%c0, %c0_0] : memref<128x128xf32, #tpu.memory_space<vmem>>, vector<128x128xf32>
    %c0_1 = arith.constant 0 : index
    %c0_2 = arith.constant 0 : index
    %1 = vector.load %arg2[%c0_1, %c0_2] : memref<128x128xf32, #tpu.memory_space<vmem>>, vector<128x128xf32>
    %cst = arith.constant dense<0.000000e+00> : vector<128x128xf32>
    %2 = tpu.matmul %0, %1, %cst {dimension_numbers = #tpu.dot_dimension_numbers<[1], [0], [0], [1], [0, 0, 1, 1], [], []>} : vector<128x128xf32>, vector<128x128xf32>, vector<128x128xf32> -> vector<128x128xf32>
    %c0_3 = arith.constant 0 : index
    %c0_4 = arith.constant 0 : index
    %3 = vector.load %arg3[%c0_3, %c0_4] : memref<1x128xf32, #tpu.memory_space<vmem>>, vector<1x128xf32>
    %4 = vector.broadcast %3 : vector<1x128xf32> to vector<128x128xf32>
    %5 = arith.addf %2, %4 : vector<128x128xf32>
    %cst_5 = arith.constant 0.000000e+00 : f32
    %6 = vector.broadcast %cst_5 : f32 to vector<128x128xf32>
    %7 = arith.maximumf %5, %6 : vector<128x128xf32>
    %c0_6 = arith.constant 0 : index
    %c0_7 = arith.constant 0 : index
    %8 = vector.load %arg4[%c0_6, %c0_7] : memref<1x128xf32, #tpu.memory_space<vmem>>, vector<1x128xf32>
    %cst_8 = arith.constant dense<0.000000e+00> : vector<1x128xf32>
    %9 = tpu.matmul %8, %7, %cst_8 {dimension_numbers = #tpu.dot_dimension_numbers<[1], [1], [0], [0], [0, 0, 1, 0], [], []>} : vector<1x128xf32>, vector<128x128xf32>, vector<1x128xf32> -> vector<1x128xf32>
    %c0_9 = arith.constant 0 : index
    %c0_10 = arith.constant 0 : index
    %10 = memref.load %arg5[%c0_9, %c0_10] : memref<1x1xf32, #tpu.memory_space<smem>>
    %11 = vector.broadcast %10 : f32 to vector<1x128xf32>
    %12 = arith.addf %9, %11 : vector<1x128xf32>
    %c0_11 = arith.constant 0 : index
    %c0_12 = arith.constant 0 : index
    %c0_13 = arith.constant 0 : index
    %13 = vector.load %arg6[%c0_11, %c0_12, %c0_13] : memref<1x1x128xf32, #tpu.memory_space<vmem>>, vector<1x1x128xf32>
    %14 = vector.shape_cast %13 : vector<1x1x128xf32> to vector<1x128xf32>
    %15 = vector.shape_cast %12 : vector<1x128xf32> to vector<1x1x128xf32>
    tpu.vector_store %arg6[%c0_11, %c0_12, %c0_13], %15 {strides = array<i32>} : memref<1x1x128xf32, #tpu.memory_space<vmem>>, vector<1x1x128xf32>,
    return
  }
  func.func @transform_0(%arg0: i32) -> (i32, i32) {
    %c0_i32 = arith.constant 0 : i32
    %c0_i32_0 = arith.constant 0 : i32
    return %arg0, %c0_i32 : i32, i32
  }
  func.func @transform_1(%arg0: i32) -> (i32, i32) {
    %c0_i32 = arith.constant 0 : i32
    %c0_i32_0 = arith.constant 0 : i32
    %c0_i32_1 = arith.constant 0 : i32
    return %c0_i32, %c0_i32_0 : i32, i32
  }
  func.func @transform_2(%arg0: i32) -> (i32, i32) {
    %c0_i32 = arith.constant 0 : i32
    %c0_i32_0 = arith.constant 0 : i32
    %c0_i32_1 = arith.constant 0 : i32
    return %c0_i32, %c0_i32_0 : i32, i32
  }
  func.func @transform_3(%arg0: i32) -> (i32, i32) {
    %c0_i32 = arith.constant 0 : i32
    %c0_i32_0 = arith.constant 0 : i32
    %c0_i32_1 = arith.constant 0 : i32
    return %c0_i32, %c0_i32_0 : i32, i32
  }
  func.func @transform_4(%arg0: i32) -> (i32, i32) {
    %c0_i32 = arith.constant 0 : i32
    %c0_i32_0 = arith.constant 0 : i32
    %c0_i32_1 = arith.constant 0 : i32
    return %c0_i32, %c0_i32_0 : i32, i32
  }
  func.func @transform_5(%arg0: i32) -> (i32, i32, i32) {
    %c0_i32 = arith.constant 0 : i32
    %c0_i32_0 = arith.constant 0 : i32
    %c0_i32_1 = arith.constant 0 : i32
    return %arg0, %c0_i32, %c0_i32_0 : i32, i32, i32
  }
}

</mosaic_0001>

<bundles_post_ra>
// kernel: tpu_custom_call.1
= control target key start
LH: loop header
LB: loop body
LE: loop exit
PB: predicated region body
PF: predicated region fallthrough
CT: control target
= control target key end

     0   :  { %11 = vsyncpa [#allocation4], 0  ;;  %s635_s0 = inlined_call_operand.hbm [shape: f32[128,128], index: 0, kind: input, shape index: {}]   ;;  %s636_s1 = inlined_call_operand.hbm [shape: f32[128,128], index: 1, kind: input, shape index: {}]   ;;  %s637_s2 = inlined_call_operand.vmem [shape: f32[1,128], index: 2, kind: input, shape index: {}]   ;;  %s638_s3 = inlined_call_operand.vmem [shape: f32[1,128], index: 3, kind: input, shape index: {}]   ;;  %s639_s4 = inlined_call_operand.<no memory space> [shape: f32[1,1], index: 4, kind: input, shape index: {}]   ;;  %s640_s5 = inlined_call_operand.hbm [shape: f32[1,1,128], index: 5, kind: output, shape index: {}]  }
   0x1   :  { %12 = vsyncpa [#allocation7], 0 }
   0x2   :  { %13 = vsyncpa [#allocation5], 0  ;;  %s554_s18 = smov [#allocation3]  }
   0x3   :  { %s19_s19 = sshll.u32 %s554_s18, 4  ;;  %s20_s19 = int_to_ptr.vmem [resolvable:$true] %s19_s19 }
   0x4   :  { %s496_s20 = scalar_lea.vmem %s20_s19, 2048  ;;  %p501_p1 = scmp.lt.s32.totalorder %s20_s19, %s20_s19 }
   0x5   :  { %p497_p0 = scmp.ne.s32.totalorder %s20_s19, %s496_s20  ;;  %p502_p2 = scmp.lt.s32.totalorder %s496_s20, %s496_s20 }
   0x7   :  { %p503_p3 = por %p502_p2, %p501_p1 }
   0x9   :  { %p504_p4 = pnand %p503_p3, %p497_p0 }
   0xb   :  { %507 = shalt.err (!%p504_p4)
}
   0xc   :  { %s555_s21 = smov 128   ;;  %s556_s22 = smov 8  }
   0xd   :  { %25 = dma.hbm_to_vmem [thread:$0]  %s635_s0, 2048, %s20_s19, [#allocation4], %s555_s21, %s555_s21, %s556_s22  }
   0xe   :  { %s557_s25 = smov [#allocation6]  }
   0xf   :  { %s31_s26 = sshll.u32 %s557_s25, 4  ;;  %s32_s26 = int_to_ptr.vmem [resolvable:$true] %s31_s26 }
  0x10   :  { %s516_s27 = scalar_lea.vmem %s32_s26, 2048  ;;  %p521_p6 = scmp.lt.s32.totalorder %s32_s26, %s32_s26 }
  0x11   :  { %p517_p5 = scmp.ne.s32.totalorder %s32_s26, %s516_s27  ;;  %p522_p7 = scmp.lt.s32.totalorder %s516_s27, %s516_s27 }
  0x13   :  { %p523_p8 = por %p522_p7, %p521_p6 }
  0x15   :  { %p524_p9 = pnand %p523_p8, %p517_p5 }
  0x17   :  { %527 = shalt.err (!%p524_p9)
}
  0x18   :  { %37 = dma.hbm_to_vmem [thread:$0]  %s636_s1, 2048, %s32_s26, [#allocation7], %s555_s21, %s555_s21, %s556_s22  }
  0x19   :  { %548 = dma.done.wait [#allocation4], 2048  }
  0x1a   :  { %549 = vsyncadd [#allocation4], 4294965248 }
  0x1b   :  { %550 = dma.done.wait [#allocation7], 2048  }
  0x1c   :  { %551 = vsyncadd [#allocation7], 4294965248  ;;  %v81_v0 = vld [vmem:[#allocation6 + $0x78] sm:$0xff]  ;;  %v80_v1 = vld [vmem:[#allocation6 + $0x70] sm:$0xff]  ;;  %v558_v32 = vmov 0.0   ;;  %vm559_vm0 = vmmov 0  }
  0x1d   :  { %390 = vmatprep.subr.mxu0 %v81_v0  ;;  %v79_v2 = vld [vmem:[#allocation6 + $0x68] sm:$0xff]  ;;  %v78_v3 = vld [vmem:[#allocation6 + $0x60] sm:$0xff]  ;;  %v77_v5 = vld [vmem:[#allocation6 + $0x58] sm:$0xff]  ;;  %446 = vmatprep.subr.mxu1 %v558_v32  ;;  %s560_s8 = smov [#allocation8]  }
  0x1e   :  { %391 = vmatpush3.msra.mxu0 %v81_v0  ;;  %v50_v4 = vld [vmem:[#allocation3] sm:$0xff]  ;;  %v76_v6 = vld [vmem:[#allocation6 + $0x50] sm:$0xff]  ;;  %v75_v7 = vld [vmem:[#allocation6 + $0x48] sm:$0xff]  ;;  %478 = vmatprep.mubr.msk.f32.mxu1 %vm559_vm0, %v558_v32  ;;  %s330_s9 = sshll.u32 %s560_s8, 4  ;;  %s331_s9 = int_to_ptr.vmem [resolvable:$true] %s330_s9 }
  0x1f   :  { %392 = vmatprep.subr.mxu0 %v80_v1  ;;  %422 = vmatprep.mubr.f32.mxu0 %v50_v4  ;;  %v74_v8 = vld [vmem:[#allocation6 + $0x40] sm:$0xff]  ;;  %v73_v9 = vld [vmem:[#allocation6 + $0x38] sm:$0xff]  ;;  %v72_v10 = vld [vmem:[#allocation6 + $0x30] sm:$0xff]  ;;  %s528_s10 = scalar_lea.vmem %s331_s9, 16  ;;  %s532_s11 = scalar_lea.vmem %s331_s9, 32 }
  0x20   :  { %393 = vmatpush3.msra.mxu0 %v80_v1  ;;  %v71_v11 = vld [vmem:[#allocation6 + $0x28] sm:$0xff]  ;;  %v70_v12 = vld [vmem:[#allocation6 + $0x20] sm:$0xff]  ;;  %v69_v13 = vld [vmem:[#allocation6 + $0x18] sm:$0xff]  ;;  %p529_p10 = scmp.ne.s32.totalorder %s331_s9, %s528_s10  ;;  %p533_p11 = scmp.lt.s32.totalorder %s331_s9, %s331_s9 }
  0x21   :  { %394 = vmatprep.subr.mxu0 %v79_v2  ;;  %v68_v14 = vld [vmem:[#allocation6 + $0x10] sm:$0xff]  ;;  %v67_v15 = vld [vmem:[#allocation6 + $0x8] sm:$0xff]  ;;  %v66_v16 = vld [vmem:[#allocation6] sm:$0xff]  ;;  %p534_p12 = scmp.lt.s32.totalorder %s532_s11, %s528_s10 }
  0x22   :  { %395 = vmatpush3.msra.mxu0 %v79_v2  ;;  %v51_v17 = vld [vmem:[#allocation3 + $0x8] sm:$0xff]  ;;  %v52_v18 = vld [vmem:[#allocation3 + $0x10] sm:$0xff]  ;;  %v53_v19 = vld [vmem:[#allocation3 + $0x18] sm:$0xff] }
  0x23   :  { %396 = vmatprep.subr.mxu0 %v78_v3  ;;  %v54_v20 = vld [vmem:[#allocation3 + $0x20] sm:$0xff]  ;;  %v55_v21 = vld [vmem:[#allocation3 + $0x28] sm:$0xff]  ;;  %v56_v22 = vld [vmem:[#allocation3 + $0x30] sm:$0xff]  ;;  %p535_p13 = por %p534_p12, %p533_p11 }
  0x24   :  { %397 = vmatpush3.msra.mxu0 %v78_v3  ;;  %v57_v23 = vld [vmem:[#allocation3 + $0x38] sm:$0xff]  ;;  %v58_v24 = vld [vmem:[#allocation3 + $0x40] sm:$0xff]  ;;  %v59_v25 = vld [vmem:[#allocation3 + $0x48] sm:$0xff] }
  0x25   :  { %398 = vmatprep.subr.mxu0 %v77_v5  ;;  %v60_v26 = vld [vmem:[#allocation3 + $0x50] sm:$0xff]  ;;  %v61_v27 = vld [vmem:[#allocation3 + $0x58] sm:$0xff]  ;;  %v62_v28 = vld [vmem:[#allocation3 + $0x60] sm:$0xff]  ;;  %p536_p0 = pnand %p535_p13, %p529_p10 }
  0x26   :  { %399 = vmatpush3.msra.mxu0 %v77_v5  ;;  %v63_v29 = vld [vmem:[#allocation3 + $0x68] sm:$0xff]  ;;  %v64_v30 = vld [vmem:[#allocation3 + $0x70] sm:$0xff]  ;;  %v65_v31 = vld [vmem:[#allocation3 + $0x78] sm:$0xff] }
  0x27   :  { %400 = vmatprep.subr.mxu0 %v76_v6  ;;  %v340_v47 = vld [vmem:[%s637_s2] ss:$0 sm:$0xff] }
  0x28   :  { %401 = vmatpush3.msra.mxu0 %v76_v6 }
  0x29   :  { %402 = vmatprep.subr.mxu0 %v75_v7 }
  0x2a   :  { %403 = vmatpush3.msra.mxu0 %v75_v7 }
  0x2b   :  { %404 = vmatprep.subr.mxu0 %v74_v8 }
  0x2c   :  { %405 = vmatpush3.msra.mxu0 %v74_v8 }
  0x2d   :  { %406 = vmatprep.subr.mxu0 %v73_v9 }
  0x2e   :  { %407 = vmatpush3.msra.mxu0 %v73_v9 }
  0x2f   :  { %408 = vmatprep.subr.mxu0 %v72_v10 }
  0x30   :  { %409 = vmatpush3.msra.mxu0 %v72_v10 }
  0x31   :  { %410 = vmatprep.subr.mxu0 %v71_v11 }
  0x32   :  { %411 = vmatpush3.msra.mxu0 %v71_v11 }
  0x33   :  { %412 = vmatprep.subr.mxu0 %v70_v12 }
  0x34   :  { %413 = vmatpush3.msra.mxu0 %v70_v12 }
  0x35   :  { %414 = vmatprep.subr.mxu0 %v69_v13 }
  0x36   :  { %415 = vmatpush3.msra.mxu0 %v69_v13 }
  0x37   :  { %416 = vmatprep.subr.mxu0 %v68_v14 }
  0x38   :  { %417 = vmatpush3.msra.mxu0 %v68_v14 }
  0x39   :  { %418 = vmatprep.subr.mxu0 %v67_v15 }
  0x3a   :  { %419 = vmatpush3.msra.mxu0 %v67_v15 }
  0x3b   :  { %420 = vmatprep.subr.mxu0 %v66_v16 }
  0x3c   :  { %421 = vmatpush3.msra.mxu0 %v66_v16 }
  0x3d   :  { %423 = vmatmul.mubr.f32.vlgmr.msra.gmra.mxu0 %v51_v17 }
  0x3e   :  { %425 = vmatprep.mubr.f32.mxu0 %v52_v18  ;;  %v250_v18 = vld [vmem:[%s638_s3] sm:$0x1] }
  0x41   :  { %426 = vmatmul.mubr.f32.gmra.mxu0 %v53_v19  ;;  %v252_v19 = vstv %s639_s4 }
  0x42   :  { %428 = vmatprep.mubr.f32.mxu0 %v54_v20 }
  0x45   :  { %429 = vmatmul.mubr.f32.gmra.mxu0 %v55_v21 }
  0x46   :  { %431 = vmatprep.mubr.f32.mxu0 %v56_v22 }
  0x49   :  { %432 = vmatmul.mubr.f32.gmra.mxu0 %v57_v23 }
  0x4a   :  { %434 = vmatprep.mubr.f32.mxu0 %v58_v24 }
  0x4d   :  { %435 = vmatmul.mubr.f32.gmra.mxu0 %v59_v25 }
  0x4e   :  { %437 = vmatprep.mubr.f32.mxu0 %v60_v26 }
  0x51   :  { %438 = vmatmul.mubr.f32.gmra.mxu0 %v61_v27 }
  0x52   :  { %440 = vmatprep.mubr.f32.mxu0 %v62_v28 }
  0x55   :  { %441 = vmatmul.mubr.f32.gmra.mxu0 %v63_v29 }
  0x56   :  { %443 = vmatprep.mubr.f32.mxu0 %v64_v30 }
  0x59   :  { %444 = vmatmul.mubr.f32.gmra.mxu0 %v65_v31 }
  0xfd   :  { %v599_v33 = vpop.f32.mrf.mxu0 }
  0xfe   :  { %v161_v13 = vadd.f32 %v599_v33, %v340_v47 }
  0xff   :  { %v601_v34 = vpop.f32.mrf.mxu0 }
 0x100   :  { %v235_v15 = vmax.f32 %v161_v13, 0.0  ;;  %v156_v16 = vadd.f32 %v340_v47, %v601_v34 }
 0x101   :  { %v427_v35 = vpop.f32.mrf.mxu0 }
 0x102   :  { %v171_v9 = vadd.f32 %v427_v35, %v340_v47  ;;  %v234_v17 = vmax.f32 %v156_v16, 0.0 }
 0x103   :  { %v603_v36 = vpop.f32.mrf.mxu0 }
 0x104   :  { %v237_v11 = vmax.f32 %v171_v9, 0.0  ;;  %v166_v12 = vadd.f32 %v340_v47, %v603_v36 }
 0x105   :  { %v430_v37 = vpop.f32.mrf.mxu0 }
 0x106   :  { %v181_v5 = vadd.f32 %v430_v37, %v340_v47  ;;  %v236_v14 = vmax.f32 %v166_v12, 0.0 }
 0x107   :  { %v175_v38 = vpop.f32.mrf.mxu0 }
 0x108   :  { %v239_v7 = vmax.f32 %v181_v5, 0.0  ;;  %v176_v8 = vadd.f32 %v340_v47, %v175_v38 }
 0x109   :  { %v433_v39 = vpop.f32.mrf.mxu0 }
 0x10a   :  { %v191_v1 = vadd.f32 %v433_v39, %v340_v47  ;;  %v238_v10 = vmax.f32 %v176_v8, 0.0 }
 0x10b   :  { %v185_v40 = vpop.f32.mrf.mxu0 }
 0x10c   :  { %v241_v3 = vmax.f32 %v191_v1, 0.0  ;;  %v186_v4 = vadd.f32 %v340_v47, %v185_v40 }
 0x10d   :  { %v436_v41 = vpop.f32.mrf.mxu0 }
 0x10e   :  { %v201_v61 = vadd.f32 %v436_v41, %v340_v47  ;;  %v240_v6 = vmax.f32 %v186_v4, 0.0 }
 0x10f   :  { %v195_v42 = vpop.f32.mrf.mxu0 }
 0x110   :  { %v243_v63 = vmax.f32 %v201_v61, 0.0  ;;  %v196_v0 = vadd.f32 %v340_v47, %v195_v42 }
 0x111   :  { %v439_v43 = vpop.f32.mrf.mxu0 }
 0x112   :  { %v211_v57 = vadd.f32 %v439_v43, %v340_v47  ;;  %v242_v2 = vmax.f32 %v196_v0, 0.0 }
 0x113   :  { %v205_v44 = vpop.f32.mrf.mxu0 }
 0x114   :  { %v245_v59 = vmax.f32 %v211_v57, 0.0  ;;  %v206_v60 = vadd.f32 %v340_v47, %v205_v44 }
 0x115   :  { %v442_v45 = vpop.f32.mrf.mxu0 }
 0x116   :  { %v221_v53 = vadd.f32 %v442_v45, %v340_v47  ;;  %v244_v62 = vmax.f32 %v206_v60, 0.0 }
 0x117   :  { %v215_v46 = vpop.f32.mrf.mxu0 }
 0x118   :  { %v247_v55 = vmax.f32 %v221_v53, 0.0  ;;  %v216_v56 = vadd.f32 %v340_v47, %v215_v46 }
 0x119   :  { %v445_v48 = vpop.f32.mrf.mxu0 }
 0x11a   :  { %v231_v49 = vadd.f32 %v445_v48, %v340_v47  ;;  %v246_v58 = vmax.f32 %v216_v56, 0.0 }
 0x11b   :  { %v225_v50 = vpop.f32.mrf.mxu0 }
 0x11c   :  { %v249_v51 = vmax.f32 %v231_v49, 0.0  ;;  %v226_v52 = vadd.f32 %v340_v47, %v225_v50 }
 0x11e   :  { %447 = vmatpush3.xpose.msra.mxu1 %v249_v51  ;;  %v248_v54 = vmax.f32 %v226_v52, 0.0 }
 0x11f   :  { %448 = vmatprep.subr.mxu1 %v558_v32 }
 0x122   :  { %449 = vmatpush3.xpose.msra.mxu1 %v248_v54 }
 0x123   :  { %450 = vmatprep.subr.mxu1 %v558_v32 }
 0x126   :  { %451 = vmatpush3.xpose.msra.mxu1 %v247_v55 }
 0x127   :  { %452 = vmatprep.subr.mxu1 %v558_v32 }
 0x12a   :  { %453 = vmatpush3.xpose.msra.mxu1 %v246_v58 }
 0x12b   :  { %454 = vmatprep.subr.mxu1 %v558_v32 }
 0x12e   :  { %455 = vmatpush3.xpose.msra.mxu1 %v245_v59 }
 0x12f   :  { %456 = vmatprep.subr.mxu1 %v558_v32 }
 0x132   :  { %457 = vmatpush3.xpose.msra.mxu1 %v244_v62 }
 0x133   :  { %458 = vmatprep.subr.mxu1 %v558_v32 }
 0x136   :  { %459 = vmatpush3.xpose.msra.mxu1 %v243_v63 }
 0x137   :  { %460 = vmatprep.subr.mxu1 %v558_v32 }
 0x13a   :  { %461 = vmatpush3.xpose.msra.mxu1 %v242_v2 }
 0x13b   :  { %462 = vmatprep.subr.mxu1 %v558_v32 }
 0x13e   :  { %463 = vmatpush3.xpose.msra.mxu1 %v241_v3 }
 0x13f   :  { %464 = vmatprep.subr.mxu1 %v558_v32 }
 0x142   :  { %465 = vmatpush3.xpose.msra.mxu1 %v240_v6 }
 0x143   :  { %466 = vmatprep.subr.mxu1 %v558_v32 }
 0x146   :  { %467 = vmatpush3.xpose.msra.mxu1 %v239_v7 }
 0x147   :  { %468 = vmatprep.subr.mxu1 %v558_v32 }
 0x14a   :  { %469 = vmatpush3.xpose.msra.mxu1 %v238_v10 }
 0x14b   :  { %470 = vmatprep.subr.mxu1 %v558_v32 }
 0x14e   :  { %471 = vmatpush3.xpose.msra.mxu1 %v237_v11 }
 0x14f   :  { %472 = vmatprep.subr.mxu1 %v558_v32 }
 0x152   :  { %473 = vmatpush3.xpose.msra.mxu1 %v236_v14 }
 0x153   :  { %474 = vmatprep.subr.mxu1 %v558_v32 }
 0x156   :  { %475 = vmatpush3.xpose.msra.mxu1 %v235_v15 }
 0x157   :  { %476 = vmatprep.subr.mxu1 %v558_v32 }
 0x15a   :  { %477 = vmatpush3.xpose.msra.mxu1 %v234_v17 }
 0x15d   :  { %479 = vmatmul.mubr.f32.vlgmr.msra.gmra.mxu1 %v250_v18 }
 0x21d   :  { %v319_v20 = vpop.f32.mrf.mxu1 }
 0x21e   :  { %v320_v21 = vadd.f32 %v319_v20, %v252_v19 }
 0x21f   :  { %v480_v22 = vpop.f32.mrf.mxu1 }
 0x220   :  { %323 = vst [vmem:[#allocation8] sm:$0x1] %v320_v21 }
 0x221   :  { %539 = shalt.err (!%p536_p0)
}
 0x222   :  { %333 = dma.vmem_to_hbm [thread:$0]  %s331_s9, 16, %s640_s5, [#allocation5]  }
 0x223   :  { %552 = dma.done.wait [#allocation5], 16  }
 0x224   :  { %553 = vsyncadd [#allocation5], 4294967280 }
 0x225   :  { %337 = vsyncpa [#allocation4], 1 }
 0x226   :  { %338 = vsyncpa [#allocation7], 1 }
 0x227   :  { %339 = vsyncpa [#allocation5], 1 }

</bundles_post_ra>
